<compile_context>
chip_gen: v5e
topology: v5e:2x2
jax: 0.10.0
libtpu: 0.0.40
codegen_flags: <defaults>
</compile_context>

<pallas_src>
import jax
import jax.numpy as jnp
from jax import lax
from jax.experimental import pallas as pl
from jax.experimental.pallas import tpu as pltpu


# ---------------------------------------------------------------------------
# Kernels
# ---------------------------------------------------------------------------

def _nin_kernel(x_ref, w_ref, b_ref, o_ref):
    """Single-block-C_in path.

    x_ref: (C_in, T)    one batch element, T spatial positions on lanes
    w_ref: (C_in, C_out) weight (contracted on dim 0 -> no transpose needed)
    b_ref: (C_out, 1)   bias in f32, broadcast over the lane (spatial) axis
    o_ref: (C_out, T)   output tile (NCHW-flattened layout)
    """
    y = lax.dot_general(w_ref[...], x_ref[...],
                        dimension_numbers=(((0,), (0,)), ((), ())),
                        preferred_element_type=jnp.float32)      # (C_out, T)
    o_ref[...] = (y + b_ref[...]).astype(o_ref.dtype)


def _nin_kernel_ktiled(x_ref, w_ref, b_ref, o_ref, acc_ref):
    """Reduction-tiled path (grid axis 2 = C_in blocks, 'arbitrary').

    x_ref: (TK, T), w_ref: (TK, C_out), b_ref: (C_out, 1), o_ref: (C_out, T)
    acc_ref: (C_out, T) f32 VMEM accumulator.
    """
    k = pl.program_id(2)

    @pl.when(k == 0)
    def _():
        acc_ref[...] = jnp.zeros_like(acc_ref)

    acc_ref[...] += lax.dot_general(w_ref[...], x_ref[...],
                                    dimension_numbers=(((0,), (0,)), ((), ())),
                                    preferred_element_type=jnp.float32)

    @pl.when(k == pl.num_programs(2) - 1)
    def _():
        o_ref[...] = (acc_ref[...] + b_ref[...]).astype(o_ref.dtype)


# ---------------------------------------------------------------------------
# Tiling / VMEM helpers
# ---------------------------------------------------------------------------

def _vmem_capacity_bytes():
    """Per-TensorCore VMEM; fall back to the most restrictive value (v7x)."""
    try:
        return int(pltpu.get_tpu_info().vmem_capacity_bytes)
    except Exception:
        return 64 << 20


def _largest_aligned_divisor(n, align, cap):
    """Largest divisor of n that is a multiple of `align` and <= cap (or None)."""
    best = None
    d = align
    limit = min(n, cap)
    while d <= limit:
        if n % d == 0:
            best = d
        d += align
    return best


# ---------------------------------------------------------------------------
# Wrapper
# ---------------------------------------------------------------------------

def nin_forward(x_nchw, W, b, *, k_block=None):
    """Equivalent of NiN.forward: per-pixel (C_in -> C_out) linear map, NCHW."""
    B, C_in, H, W_sp = x_nchw.shape
    C_out = W.shape[1]
    HW = H * W_sp
    dtype = x_nchw.dtype
    dtype_bytes = jnp.dtype(dtype).itemsize

    # Free reshapes at the boundary; keep weights in the activation dtype so
    # the MXU gets a homogeneous (e.g. bf16 x bf16 -> f32) matmul.
    x_flat = x_nchw.reshape(B, C_in, HW)
    W = W.astype(dtype)
    b2d = b.reshape(C_out, 1).astype(jnp.float32)   # epilogue math stays f32
    w_bytes = W.dtype.itemsize

    # ---- VMEM budget (per-generation; v7x = 64 MiB/TC, v5e/v6e = 128 MiB) ----
    vmem_cap = _vmem_capacity_bytes()
    budget = min(48 << 20, int(vmem_cap * 0.6))     # plan with headroom

    # ---- reduction (C_in) tile ----
    if k_block is not None:
        assert C_in % k_block == 0, "k_block must divide C_in"
        tk = k_block
    else:
        tk = C_in
        # Only tile the reduction if keeping all of C_in in one block would
        # squeeze the spatial tile below ~512 lanes within the budget.
        if budget // max(1, 2 * (C_in + C_out) * dtype_bytes) < 512:
            cand = _largest_aligned_divisor(C_in, 8, 1024)
            if cand is not None:
                tk = cand
    use_ktiled = tk < C_in

    # ---- spatial tile T ----
    # Per-lane VMEM cost: double-buffered x & out blocks (+ f32 accumulator
    # when reduction-tiled).  Also cap the per-step x+out data at ~8 MiB,
    # which amortizes per-step overhead and gives multi-KiB contiguous DMAs.
    per_lane = 2 * (tk + C_out) * dtype_bytes + (4 * C_out if use_ktiled else 0)
    t_data_cap = (8 << 20) // max(1, (tk + C_out) * dtype_bytes)
    t_vmem_cap = max(128, (budget - 2 * tk * C_out * w_bytes) // per_lane)
    t_cap = max(128, min(t_data_cap, t_vmem_cap))

    # v7x has 2 TensorCores: with B == 1 make sure there are >= 2 grid steps
    # along a "parallel" axis so the second core is not idle.
    hw_cap = HW // 2 if (B == 1 and HW >= 256) else HW
    T = _largest_aligned_divisor(HW, 128, min(t_cap, hw_cap))
    if T is None:
        T = HW        # fallback: full extent (legal; masked lane stores only)

    # ---- VMEM limit derived from the actual working set, with headroom ----
    need = (2 * (tk + C_out) * T * dtype_bytes
            + (C_out * T * 4 if use_ktiled else 0)
            + 2 * tk * C_out * w_bytes
            + 2 * C_out * 4)
    vmem_limit = int(min(max(32 << 20, 2 * need), int(vmem_cap * 0.85)))

    # ---- advisory cost estimate so XLA can overlap neighbors ----
    cost = pl.CostEstimate(
        flops=2 * B * HW * C_in * C_out,
        transcendentals=0,
        bytes_accessed=(B * HW * (C_in + C_out) * dtype_bytes
                        + C_in * C_out * w_bytes + C_out * 4),
    )

    out_shape = jax.ShapeDtypeStruct((B, C_out, HW), dtype)
    n_t = pl.cdiv(HW, T)

    if not use_ktiled:
        out_flat = pl.pallas_call(
            _nin_kernel,
            out_shape=out_shape,
            grid=(B, n_t),
            in_specs=[
                pl.BlockSpec((pl.Squeezed(), C_in, T),
                             lambda bi, ti: (bi, 0, ti)),
                pl.BlockSpec((C_in, C_out), lambda bi, ti: (0, 0)),
                pl.BlockSpec((C_out, 1), lambda bi, ti: (0, 0)),
            ],
            out_specs=pl.BlockSpec((pl.Squeezed(), C_out, T),
                                   lambda bi, ti: (bi, 0, ti)),
            compiler_params=pltpu.CompilerParams(
                dimension_semantics=("parallel", "parallel"),
                vmem_limit_bytes=vmem_limit),
            cost_estimate=cost,
        )(x_flat, W, b2d)
    else:
        n_k = C_in // tk
        out_flat = pl.pallas_call(
            _nin_kernel_ktiled,
            out_shape=out_shape,
            grid=(B, n_t, n_k),
            in_specs=[
                pl.BlockSpec((pl.Squeezed(), tk, T),
                             lambda bi, ti, ki: (bi, ki, ti)),
                pl.BlockSpec((tk, C_out), lambda bi, ti, ki: (ki, 0)),
                pl.BlockSpec((C_out, 1), lambda bi, ti, ki: (0, 0)),
            ],
            out_specs=pl.BlockSpec((pl.Squeezed(), C_out, T),
                                   lambda bi, ti, ki: (bi, 0, ti)),
            scratch_shapes=[pltpu.VMEM((C_out, T), jnp.float32)],
            compiler_params=pltpu.CompilerParams(
                dimension_semantics=("parallel", "parallel", "arbitrary"),
                vmem_limit_bytes=vmem_limit),
            cost_estimate=cost,
        )(x_flat, W, b2d)

    return out_flat.reshape(B, C_out, H, W_sp)    # already NCHW — free reshape


# ---------------------------------------------------------------------------
# Self-test
# ---------------------------------------------------------------------------

if __name__ == "__main__":
    def ref_nin(x, W, b):
        """Pure-JAX reference matching the PyTorch forward exactly (in f32)."""
        x_nhwc = jnp.transpose(x.astype(jnp.float32), (0, 2, 3, 1))
        y = jnp.einsum('bhwi,ik->bhwk', x_nhwc, W.astype(jnp.float32),
                       precision=lax.Precision.HIGHEST) + b.astype(jnp.float32)
        return jnp.transpose(y, (0, 3, 1, 2))

    def make_params(key, C_in, C_out, scale=0.1):
        # Mimic default_init(scale) = variance_scaling(scale,'fan_avg','uniform')
        # on shape (in_ch, out_ch) with in_axis=1, out_axis=0:
        #   receptive_field_size = 1, fan_in = out_ch, fan_out = in_ch.
        kw, kb = jax.random.split(key)
        variance = scale / ((float(C_out) + float(C_in)) / 2.0)
        limit = (3.0 * variance) ** 0.5
        W = jax.random.uniform(kw, (C_in, C_out), jnp.float32, -limit, limit)
        # Module initializes b to zeros; use a small random bias so the fused
        # bias-add path is actually exercised.
        b = 0.1 * jax.random.normal(kb, (C_out,), dtype=jnp.float32)
        return W, b

    key = jax.random.PRNGKey(0)
    k1, k2, k3, kp1, kp2, kp3 = jax.random.split(key, 6)

    # --- Test 1: default single-block-C_in path, f32, NCHW in/out -----------
    B, C_in, C_out, H, W_sp = 2, 4, 8, 16, 16
    x = jax.random.normal(k1, (B, C_in, H, W_sp), dtype=jnp.float32)
    W, b = make_params(kp1, C_in, C_out)
    out = jax.block_until_ready(nin_forward(x, W, b))
    assert out.shape == (B, C_out, H, W_sp), out.shape
    assert jnp.allclose(out, ref_nin(x, W, b), atol=1e-4, rtol=1e-4), \
        "mismatch vs reference (f32 path)"

    # --- Test 2: reduction-tiled (C_in) path + B==1 two-spatial-tile rule ---
    B, C_in, C_out, H, W_sp = 1, 16, 8, 16, 16
    x = jax.random.normal(k2, (B, C_in, H, W_sp), dtype=jnp.float32)
    W, b = make_params(kp2, C_in, C_out)
    out = jax.block_until_ready(nin_forward(x, W, b, k_block=8))
    assert out.shape == (B, C_out, H, W_sp), out.shape
    assert jnp.allclose(out, ref_nin(x, W, b), atol=1e-4, rtol=1e-4), \
        "mismatch vs reference (k-tiled path)"

    # --- Test 3: bf16 I/O path (f32 MXU accumulate + f32 epilogue) ----------
    B, C_in, C_out, H, W_sp = 2, 8, 16, 16, 16
    x = jax.random.normal(k3, (B, C_in, H, W_sp), dtype=jnp.float32)
    W, b = make_params(kp3, C_in, C_out)
    out_bf16 = jax.block_until_ready(
        nin_forward(x.astype(jnp.bfloat16), W.astype(jnp.bfloat16), b))
    assert out_bf16.dtype == jnp.bfloat16 and out_bf16.shape == (B, C_out, H, W_sp)
    ref = ref_nin(x.astype(jnp.bfloat16), W.astype(jnp.bfloat16), b)
    assert jnp.allclose(out_bf16.astype(jnp.float32), ref, atol=2e-2, rtol=2e-2), \
        "mismatch vs reference (bf16 path)"

    print("KERNEL_OK")
</pallas_src>

<mosaic_0001>
module attributes {stable_mosaic.version = 11 : i64} {
  func.func @_nin_kernel(%arg0: i32, %arg1: i32, %arg2: memref<1x4x256xf32, #tpu.memory_space<vmem>>, %arg3: memref<4x8xf32, #tpu.memory_space<vmem>>, %arg4: memref<8x1xf32, #tpu.memory_space<vmem>>, %arg5: memref<1x8x256xf32, #tpu.memory_space<vmem>>) attributes {dimension_semantics = [#tpu.dimension_semantics<parallel>, #tpu.dimension_semantics<parallel>], iteration_bounds = array<i64: 2, 1>, scalar_prefetch = 0 : i64, scratch_operands = 0 : i64, tpu.core_type = #tpu.core_type<tc>, window_params = [{transform_indices = @transform_0, window_bounds = array<i64: 1, 4, 256>}, {pipeline_mode = #tpu.pipeline_mode<synchronous>, transform_indices = @transform_1, window_bounds = array<i64: 4, 8>}, {pipeline_mode = #tpu.pipeline_mode<synchronous>, transform_indices = @transform_2, window_bounds = array<i64: 8, 1>}, {transform_indices = @transform_3, window_bounds = array<i64: 1, 8, 256>}]} {
    %c0 = arith.constant 0 : index
    %c0_0 = arith.constant 0 : index
    %0 = vector.load %arg3[%c0, %c0_0] : memref<4x8xf32, #tpu.memory_space<vmem>>, vector<4x8xf32>
    %c0_1 = arith.constant 0 : index
    %c0_2 = arith.constant 0 : index
    %c0_3 = arith.constant 0 : index
    %1 = vector.load %arg2[%c0_1, %c0_2, %c0_3] : memref<1x4x256xf32, #tpu.memory_space<vmem>>, vector<1x4x256xf32>
    %2 = vector.shape_cast %1 : vector<1x4x256xf32> to vector<4x256xf32>
    %cst = arith.constant dense<0.000000e+00> : vector<8x256xf32>
    %3 = tpu.matmul %0, %2, %cst {dimension_numbers = #tpu.dot_dimension_numbers<[0], [0], [1], [1], [0, 1, 1, 1], [], []>} : vector<4x8xf32>, vector<4x256xf32>, vector<8x256xf32> -> vector<8x256xf32>
    %c0_4 = arith.constant 0 : index
    %c0_5 = arith.constant 0 : index
    %4 = vector.load %arg4[%c0_4, %c0_5] : memref<8x1xf32, #tpu.memory_space<vmem>>, vector<8x1xf32>
    %5 = vector.broadcast %4 : vector<8x1xf32> to vector<8x256xf32>
    %6 = arith.addf %3, %5 : vector<8x256xf32>
    %c0_6 = arith.constant 0 : index
    %c0_7 = arith.constant 0 : index
    %c0_8 = arith.constant 0 : index
    %7 = vector.load %arg5[%c0_6, %c0_7, %c0_8] : memref<1x8x256xf32, #tpu.memory_space<vmem>>, vector<1x8x256xf32>
    %8 = vector.shape_cast %7 : vector<1x8x256xf32> to vector<8x256xf32>
    %9 = vector.shape_cast %6 : vector<8x256xf32> to vector<1x8x256xf32>
    tpu.vector_store %arg5[%c0_6, %c0_7, %c0_8], %9 {strides = array<i32>} : memref<1x8x256xf32, #tpu.memory_space<vmem>>, vector<1x8x256xf32>,
    return
  }
  func.func @transform_0(%arg0: i32, %arg1: i32) -> (i32, i32, i32) {
    %c0_i32 = arith.constant 0 : i32
    %c0_i32_0 = arith.constant 0 : i32
    return %arg0, %c0_i32, %arg1 : i32, i32, i32
  }
  func.func @transform_1(%arg0: i32, %arg1: i32) -> (i32, i32) {
    %c0_i32 = arith.constant 0 : i32
    %c0_i32_0 = arith.constant 0 : i32
    %c0_i32_1 = arith.constant 0 : i32
    return %c0_i32, %c0_i32_0 : i32, i32
  }
  func.func @transform_2(%arg0: i32, %arg1: i32) -> (i32, i32) {
    %c0_i32 = arith.constant 0 : i32
    %c0_i32_0 = arith.constant 0 : i32
    %c0_i32_1 = arith.constant 0 : i32
    return %c0_i32, %c0_i32_0 : i32, i32
  }
  func.func @transform_3(%arg0: i32, %arg1: i32) -> (i32, i32, i32) {
    %c0_i32 = arith.constant 0 : i32
    %c0_i32_0 = arith.constant 0 : i32
    return %arg0, %c0_i32, %arg1 : i32, i32, i32
  }
}

</mosaic_0001>

<bundles_post_ra>
// kernel: tpu_custom_call.1
= control target key start
LH: loop header
LB: loop body
LE: loop exit
PB: predicated region body
PF: predicated region fallthrough
CT: control target
= control target key end

     0   :  { %8 = vsyncpa [#allocation3], 0  ;;  %s755_s0 = inlined_call_operand.hbm [shape: f32[2,4,256], index: 0, kind: input, shape index: {}]   ;;  %s756_s1 = inlined_call_operand.vmem [shape: f32[4,8], index: 1, kind: input, shape index: {}]   ;;  %s757_s2 = inlined_call_operand.vmem [shape: f32[8,1], index: 2, kind: input, shape index: {}]   ;;  %s758_s3 = inlined_call_operand.hbm [shape: f32[2,8,256], index: 3, kind: output, shape index: {}]  }
   0x1   :  { %10 = vsyncpa [#allocation3 + $0x1], 0 }
   0x2   :  { %11 = vsyncpa [#allocation4], 0 }
   0x3   :  { %13 = vsyncpa [#allocation4 + $0x1], 0  ;;  %s628_s12 = smov 0   ;;  %s630_s13 = smov 0  }
   0x4   :  { %s632_s14 = smov 0   ;;  %s634_s15 = smov 0  }
   0x5   :  { %s636_s16 = smov 0   ;;  %s638_s17 = smov 0  }
   0x6 LB: > { %s407_s18 = sadd.s32 4294967295, %s605_s17   ;;  %s408_s19 = sadd.s32 4294967294, %s605_s17   ;;  %s605_s17 = sphi %s638_s17, %s19_s17   ;;  %s601_s16 = sphi %s636_s16, %s767_s16   ;;  %s597_s15 = sphi %s634_s15, %s766_s15   ;;  %s593_s14 = sphi %s632_s14, %s765_s14   ;;  %s589_s13 = sphi %s630_s13, %s764_s13   ;;  %s585_s12 = sphi %s628_s12, %s763_s12  }
   0x7   : > { %s31_s20 = sadd.s32 1, %s601_s16  ;;  %s40_s21 = sadd.s32 1, %s593_s14 }
   0x8   : > { %p33_p0 = scmp.ge.s32.totalorder %s31_s20, 2  ;;  %p47_p1 = scmp.ne.s32.totalorder %s593_s14, %s589_s13 }
   0x9   : > { %p48_p2 = scmp.eq.s32.totalorder %s605_s17, 0  ;;  %p53_p3 = scmp.ne.s32.totalorder %s589_s13, %s585_s12 }
   0xa   : > { %s769_s20 = smov (%p33_p0, %s31_s20), 0  ;;  %p54_p5 = scmp.eq.s32.totalorder %s407_s18, 0 }
   0xb   : > { %p669_p4 = por %p48_p2, %p47_p1  ;;  %s35_s23 = ssub.s32 %s601_s16, %s769_s20 }
   0xc   : > { %p121_p6 = scmp.eq.s32.totalorder %s407_s18, 1  ;;  %p38_p7 = scmp.eq.s32.totalorder %s35_s23, 0 }
   0xd   : > { %p675_p8 = por %p54_p5, %p53_p3  ;;  %p127_p10 = scmp.eq.s32.totalorder %s408_s19, 1 }
   0xe   : > { %p679_p9 = por %p121_p6, %p47_p1  ;;  %p410_p12 = scmp.ge.s32.totalorder %s605_s17, 2 }
   0xf   : > { %s684_s26 = scalar_select %p38_p7, %s593_s14, %s40_s21  }
  0x10   : > { %p686_p11 = por %p127_p10, %p53_p3  ;;  %p440_p13 = scmp.lt.s32.totalorder %s605_s17, 2 }
  0x11   : > { %s153_s28 = sand.u32 1, %s593_s14   ;;  %s426_s30 = sshll.u32 %s601_s16, 3 }
  0x12   : > { %s411_s29 = sshll.u32 %s153_s28, 3  ;;  %s164_s6 = scalar_lea.hbm %s755_s0, %s426_s30 }
  0x13   : > { %s157_s7 = scalar_lea.vmem [#allocation2], %s411_s29  ;;  %s166_s9 = sshll.u32 %s164_s6, 4  ;;  %s167_s9 = int_to_ptr.hbm [resolvable:$true] %s166_s9 }
  0x14   : > { %s168_s8 = sshll.u32 %s157_s7, 4  ;;  %p433_p0 = pnand %p440_p13, %p669_p4  ;;  %s169_s8 = int_to_ptr.vmem [resolvable:$true] %s168_s8 }
  0x15   : > { %p414_p1 = scmp.ge.s32.totalorder %s605_s17, 1  ;;  %p173_p2 = scmp.lt.s32.totalorder %s605_s17, 3 }
  0x16   : > { %s154_s10 = scalar_lea.sflag [#allocation3], %s153_s28 }
  0x17   : > { %435 = dma.hbm_to_vmem [thread:$0]  (!%p433_p0), %s167_s9, 128, %s169_s8, %s154_s10  }
  0x18   : > { %p174_p3 = pnand %p414_p1, %p173_p2 }
  0x19   : > { %s702_s11 = sand.u32 (!%p174_p3), 1, %s589_s13  }
  0x1a   : > { %177 = sbr.rel (%p174_p3) target bundleno = 330 (0x14a), region = 32  ;;  %s415_s18 = sshll.u32 (!%p174_p3), %s702_s11, 3 }
  0x1b   : > { %s180_s19 = scalar_lea.sflag (!%p174_p3), [#allocation3], %s702_s11  ;;  %s183_s21 = scalar_lea.vmem (!%p174_p3), [#allocation2], %s415_s18 }
  0x1f   : > { %576 = dma.done.wait (%p675_p8), %s180_s19, 128  }
  0x20   : > { %578 = vsyncadd (%p675_p8), %s180_s19, 4294967168  ;;  %v210_v0 = vld [vmem:[%s183_s21] sm:$0xff]  ;;  %v209_v1 = vld [vmem:[%s756_s1] sm:$0xf]  ;;  %vm257_vm0 = vcmask 1043456   ;;  %v607_v5 = vmov 0  }
  0x21   : > { %250 = vst [vmem:[#allocation1] ss:$2 sm:$0xff] %v210_v0  ;;  %217 = vxpose.xlu0.b32.start.end [1/1] (short) (narrow) %v209_v1, 8  ;;  %v211_v4 = vld [vmem:[%s757_s2] sm:$0xff]  ;;  %vm253_vm1 = vcmask 31744   ;;  %s416_s24 = sshll.u32 %s702_s11, 4 }
  0x22   : > { %s427_s30 = sshll.u32 %s597_s15, 4  ;;  %s206_s7 = scalar_lea.vmem [#allocation5], %s416_s24 }
  0x23   : > { %s318_s6 = scalar_lea.hbm %s758_s3, %s427_s30  ;;  %s320_s8 = sshll.u32 %s206_s7, 4  ;;  %s321_s8 = int_to_ptr.vmem [resolvable:$true] %s320_s8 }
  0x24   : > { %s322_s9 = sshll.u32 %s318_s6, 4  ;;  %s305_s10 = scalar_lea.sflag [#allocation4], %s702_s11  ;;  %s323_s9 = int_to_ptr.hbm [resolvable:$true] %s322_s9 }
  0x25   : > { %s537_s18 = sshra.s32 %s323_s9, 4  ;;  %s543_s22 = scalar_lea.hbm %s758_s3, 32  ;;  %s538_s18 = int_to_ptr.hbm [resolvable:$true] %s537_s18 }
  0x26   : > { %s539_s15 = scalar_lea.hbm %s538_s18, 16  ;;  %p544_p7 = scmp.lt.s32.totalorder %s538_s18, %s758_s3 }
  0x27   : > { %p540_p4 = scmp.ne.s32.totalorder %s538_s18, %s539_s15  ;;  %p545_p8 = scmp.lt.s32.totalorder %s543_s22, %s539_s15 }
  0x28   : > { %v251_v2 = vld.sshfl [vmem:[#allocation1] sm:$0xff pattern:$0x75316420]  ;;  %v252_v3 = vld.sshfl [vmem:[#allocation1 + $0x8] sm:$0xff pattern:$0x75316420] }
  0x29   : > { %417 = vmatpush.msk.msra.mxu0 %vm257_vm0, %v251_v2  ;;  %419 = vmatpush.msk.msra.mxu1 %vm257_vm0, %v252_v3  ;;  %p541_p5 = pnand %p540_p4, %p679_p9  ;;  %p546_p10 = por %p545_p8, %p544_p7 }
  0x2b   : > { %p542_p6 = pneg %p541_p5 }
  0x2d   : > { %p547_p13 = pnand %p546_p10, %p542_p6 }
  0x88   : > { %492 = vset.pattern.permute.xlu0 %v607_v5 }
  0x8f   : > { %214 = vperm.xlu0 %492, %v211_v4  }
  0xc5   : > { %v233_v6 = vpop.trf.xlu0 }
  0xc6   : > { %418 = vmatmul.msk.f32.vlgmr.msra.gmra.mxu0 %vm253_vm1, %v233_v6  ;;  %420 = vmatmul.msk.f32.vlgmr.msra.gmra.mxu1 %vm253_vm1, %v233_v6 }
 0x101   : > { %v215_v7 = vpop.permute.xlu0 %214 }
 0x143   : > { %v279_v8 = vpop.f32.mrf.mxu0  ;;  %v299_v9 = vpop.f32.mrf.mxu1 }
 0x144   : > { %v280_v10 = vadd.f32 %v279_v8, %v215_v7  ;;  %v300_v11 = vadd.f32 %v299_v9, %v215_v7 }
 0x146   : > { %302 = vst [vmem:[%s206_s7] sm:$0xff] %v280_v10 }
 0x147   : > { %303 = vst [vmem:[%s206_s7 + $0x8] sm:$0xff] %v300_v11 }
 0x148   : > { %550 = shalt.err (!%p547_p13)
}
 0x149   : > { %430 = dma.vmem_to_hbm [thread:$0]  (%p679_p9), %s321_s8, 256, %s323_s9, %s305_s10  }
 0x14a PF: > { %s334_s11 = sand.u32 1, %s585_s12   ;;  %p437_p0 = pnand %p410_p12, %p686_p11 }
 0x14b   : > { %s335_s29 = scalar_lea.sflag [#allocation4], %s334_s11 }
 0x14c   : > { %p438_p1 = pneg %p437_p0 }
 0x14e   : > { %580 = dma.done.wait (%p438_p1), %s335_s29, 256  }
 0x14f   : > { %582 = vsyncadd (%p438_p1), %s335_s29, 4294967040  ;;  %s19_s17 = sadd.s32 1, %s605_s17   ;;  %s763_s12 = smov %s589_s13 }
 0x150   : > { %p16_p2 = scmp.ge.s32.totalorder %s19_s17, 4   ;;  %s764_s13 = smov %s593_s14 }
 0x151   : > { %s765_s14 = smov %s684_s26  ;;  %s766_s15 = smov %s601_s16 }
 0x152   : > { %s767_s16 = smov %s769_s20  ;;  %18 = sbr.rel (!%p16_p2) target bundleno = 6 (0x6), region = 77 }
 0x157   :  { %341 = vsyncpa [#allocation3], 1 }
 0x158   :  { %343 = vsyncpa [#allocation3 + $0x1], 1 }
 0x159   :  { %344 = vsyncpa [#allocation4], 1 }
 0x15a   :  { %346 = vsyncpa [#allocation4 + $0x1], 1 }

</bundles_post_ra>
